<compile_context>
chip_gen: v7x
topology: tpu7x:2x2x1
jax: 0.10.0
libtpu: 0.0.40
codegen_flags: <defaults>
</compile_context>

<pallas_src>
import jax
import jax.numpy as jnp
from jax.experimental import pallas as pl
from jax.experimental.pallas import tpu as pltpu


def attention_mlp_kernel(
    x_ref,
    w1a_ref, b1a_ref, w1b_ref, b1b_ref,   # mlp1: F->3F->F   (weights bf16, biases f32)
    w2a_ref, b2a_ref, w2b_ref, b2b_ref,   # mlp2: F->3F->F
    w3_ref, b3_ref,                       # mlp3: F->C_pad
    out_ref,
):
    x = x_ref[...]                                                    # [TM, F] f32

    # --- mlp1 -> sigmoid mask (bf16 MXU operands, f32 accumulation) ---
    h1 = jnp.dot(x.astype(jnp.bfloat16), w1a_ref[...],
                 preferred_element_type=jnp.float32) + b1a_ref[...]
    h1 = jnp.maximum(h1, 0.0)                                         # ReLU (f32 VPU)
    m1 = jnp.dot(h1.astype(jnp.bfloat16), w1b_ref[...],
                 preferred_element_type=jnp.float32) + b1b_ref[...]
    mask = jax.nn.sigmoid(m1)                                         # f32 EUP

    new_feat = mask * x                                               # [TM, F] f32

    # --- mlp2 + residual ---
    h2 = jnp.dot(new_feat.astype(jnp.bfloat16), w2a_ref[...],
                 preferred_element_type=jnp.float32) + b2a_ref[...]
    h2 = jnp.maximum(h2, 0.0)
    m2 = jnp.dot(h2.astype(jnp.bfloat16), w2b_ref[...],
                 preferred_element_type=jnp.float32) + b2b_ref[...]
    xr = m2 + new_feat                                                # [TM, F] f32

    # --- mlp3 (classifier head, lane-dense padded output) ---
    out = jnp.dot(xr.astype(jnp.bfloat16), w3_ref[...],
                  preferred_element_type=jnp.float32) + b3_ref[...]
    out_ref[...] = out.astype(out_ref.dtype)                          # [TM, C_pad]


def attention_mlp(features, params, *, tm=512):
    """features: [B, F] float32. params: dict of weights (in, out) and biases (1, out)."""
    B, F = features.shape
    C = params["b3"].shape[-1]

    # ---- lane-dense classifier: pad C up to a multiple of 128 ----
    C_pad = max(128, ((C + 127) // 128) * 128)
    w3 = params["w3"]
    b3 = params["b3"]
    if C_pad != C:
        w3 = jnp.pad(w3, ((0, 0), (0, C_pad - C)))
        b3 = jnp.pad(b3, ((0, 0), (0, C_pad - C)))

    # ---- batch tiling: multiple-of-8 tile, pad rows so B_pad % TM == 0 ----
    tm_eff = min(tm, ((B + 7) // 8) * 8)
    num_tiles = pl.cdiv(B, tm_eff)
    B_pad = num_tiles * tm_eff
    x = features
    if B_pad != B:
        x = jnp.pad(x, ((0, B_pad - B), (0, 0)))

    # ---- pre-cast weights to bf16 (MXU operands); biases stay f32 ----
    bf = jnp.bfloat16
    args = (
        x,
        params["w1a"].astype(bf), params["b1a"],
        params["w1b"].astype(bf), params["b1b"],
        params["w2a"].astype(bf), params["b2a"],
        params["w2b"].astype(bf), params["b2b"],
        w3.astype(bf), b3,
    )

    def resident(arr):
        # Whole array as one block, same block every grid step -> DMA'd once.
        return pl.BlockSpec(arr.shape, lambda i: (0, 0))

    in_specs = [
        pl.BlockSpec((tm_eff, F), lambda i: (i, 0)),   # activation tile, pipelined
        resident(args[1]), resident(args[2]),
        resident(args[3]), resident(args[4]),
        resident(args[5]), resident(args[6]),
        resident(args[7]), resident(args[8]),
        resident(args[9]), resident(args[10]),
    ]
    out_specs = pl.BlockSpec((tm_eff, C_pad), lambda i: (i, 0))

    out_pad = pl.pallas_call(
        attention_mlp_kernel,
        out_shape=jax.ShapeDtypeStruct((B_pad, C_pad), jnp.float32),
        grid=(num_tiles,),
        in_specs=in_specs,
        out_specs=out_specs,
        compiler_params=pltpu.CompilerParams(
            dimension_semantics=("parallel",),
        ),
    )(*args)

    return out_pad[:B, :C]


def init_params(key, num_features, num_classes):
    """Deterministic synthetic parameter init (shapes match the PyTorch module)."""
    inter = num_features * 3
    keys = jax.random.split(key, 10)

    def lin(kw, fan_in, fan_out):
        # Weight stored as (in, out); bias as (1, out).
        return jax.random.normal(kw, (fan_in, fan_out), jnp.float32) * (1.0 / jnp.sqrt(fan_in))

    return {
        # mlp1: F -> 3F -> F
        "w1a": lin(keys[0], num_features, inter),
        "b1a": jax.random.normal(keys[1], (1, inter), jnp.float32) * 0.01,
        "w1b": lin(keys[2], inter, num_features),
        "b1b": jax.random.normal(keys[3], (1, num_features), jnp.float32) * 0.01,
        # mlp2: F -> 3F -> F
        "w2a": lin(keys[4], num_features, inter),
        "b2a": jax.random.normal(keys[5], (1, inter), jnp.float32) * 0.01,
        "w2b": lin(keys[6], inter, num_features),
        "b2b": jax.random.normal(keys[7], (1, num_features), jnp.float32) * 0.01,
        # mlp3: F -> C
        "w3": lin(keys[8], num_features, num_classes),
        "b3": jax.random.normal(keys[9], (1, num_classes), jnp.float32) * 0.01,
    }


def attention_mlp_ref(features, params):
    """Pure-JAX f32 reference for correctness checking."""
    def mlp2layer(x, wa, ba, wb, bb):
        h = jnp.maximum(x @ wa + ba, 0.0)
        return h @ wb + bb

    mask = jax.nn.sigmoid(mlp2layer(features, params["w1a"], params["b1a"],
                                    params["w1b"], params["b1b"]))
    new_feat = mask * features
    x = mlp2layer(new_feat, params["w2a"], params["b2a"],
                  params["w2b"], params["b2b"]) + new_feat
    return x @ params["w3"] + params["b3"]


if __name__ == "__main__":
    # batch deliberately NOT a multiple of the tile to exercise row padding,
    # and tm=128 so the grid has >1 step.
    B, F, C = 200, 32, 8   # intermediate = 3*F = 96

    key = jax.random.PRNGKey(0)
    k_x, k_p = jax.random.split(key)
    features = jax.random.normal(k_x, (B, F), jnp.float32)
    params = init_params(k_p, F, C)

    out = attention_mlp(features, params, tm=128)
    out = jax.block_until_ready(out)

    ref = attention_mlp_ref(features, params)
    assert out.shape == (B, C), out.shape
    # Tolerance relaxed vs pure-f32 because matmul operands are bf16
    # (accumulation stays f32).
    assert jnp.allclose(out, ref, atol=5e-2, rtol=5e-2), (
        "mismatch vs JAX reference: max abs err = "
        f"{float(jnp.max(jnp.abs(out - ref)))}"
    )

    print("KERNEL_OK")
</pallas_src>

<mosaic_0001>
module attributes {stable_mosaic.version = 11 : i64} {
  func.func @attention_mlp_kernel(%arg0: i32, %arg1: memref<128x32xf32, #tpu.memory_space<vmem>>, %arg2: memref<32x96xbf16, #tpu.memory_space<vmem>>, %arg3: memref<1x96xf32, #tpu.memory_space<vmem>>, %arg4: memref<96x32xbf16, #tpu.memory_space<vmem>>, %arg5: memref<1x32xf32, #tpu.memory_space<vmem>>, %arg6: memref<32x96xbf16, #tpu.memory_space<vmem>>, %arg7: memref<1x96xf32, #tpu.memory_space<vmem>>, %arg8: memref<96x32xbf16, #tpu.memory_space<vmem>>, %arg9: memref<1x32xf32, #tpu.memory_space<vmem>>, %arg10: memref<32x128xbf16, #tpu.memory_space<vmem>>, %arg11: memref<1x128xf32, #tpu.memory_space<vmem>>, %arg12: memref<128x128xf32, #tpu.memory_space<vmem>>) attributes {dimension_semantics = [#tpu.dimension_semantics<parallel>], iteration_bounds = array<i64: 2>, scalar_prefetch = 0 : i64, scratch_operands = 0 : i64, tpu.core_type = #tpu.core_type<tc>, window_params = [{transform_indices = @transform_0, window_bounds = array<i64: 128, 32>}, {pipeline_mode = #tpu.pipeline_mode<synchronous>, transform_indices = @transform_1, window_bounds = array<i64: 32, 96>}, {pipeline_mode = #tpu.pipeline_mode<synchronous>, transform_indices = @transform_2, window_bounds = array<i64: 1, 96>}, {pipeline_mode = #tpu.pipeline_mode<synchronous>, transform_indices = @transform_3, window_bounds = array<i64: 96, 32>}, {pipeline_mode = #tpu.pipeline_mode<synchronous>, transform_indices = @transform_4, window_bounds = array<i64: 1, 32>}, {pipeline_mode = #tpu.pipeline_mode<synchronous>, transform_indices = @transform_5, window_bounds = array<i64: 32, 96>}, {pipeline_mode = #tpu.pipeline_mode<synchronous>, transform_indices = @transform_6, window_bounds = array<i64: 1, 96>}, {pipeline_mode = #tpu.pipeline_mode<synchronous>, transform_indices = @transform_7, window_bounds = array<i64: 96, 32>}, {pipeline_mode = #tpu.pipeline_mode<synchronous>, transform_indices = @transform_8, window_bounds = array<i64: 1, 32>}, {pipeline_mode = #tpu.pipeline_mode<synchronous>, transform_indices = @transform_9, window_bounds = array<i64: 32, 128>}, {pipeline_mode = #tpu.pipeline_mode<synchronous>, transform_indices = @transform_10, window_bounds = array<i64: 1, 128>}, {transform_indices = @transform_11, window_bounds = array<i64: 128, 128>}]} {
    %c0 = arith.constant 0 : index
    %c0_0 = arith.constant 0 : index
    %0 = vector.load %arg1[%c0, %c0_0] : memref<128x32xf32, #tpu.memory_space<vmem>>, vector<128x32xf32>
    %1 = arith.truncf %0 : vector<128x32xf32> to vector<128x32xbf16>
    %c0_1 = arith.constant 0 : index
    %c0_2 = arith.constant 0 : index
    %2 = vector.load %arg2[%c0_1, %c0_2] : memref<32x96xbf16, #tpu.memory_space<vmem>>, vector<32x96xbf16>
    %cst = arith.constant dense<0.000000e+00> : vector<128x96xf32>
    %3 = tpu.matmul %1, %2, %cst {dimension_numbers = #tpu.dot_dimension_numbers<[1], [0], [0], [1], [0, 0, 1, 1], [], []>} : vector<128x32xbf16>, vector<32x96xbf16>, vector<128x96xf32> -> vector<128x96xf32>
    %c0_3 = arith.constant 0 : index
    %c0_4 = arith.constant 0 : index
    %4 = vector.load %arg3[%c0_3, %c0_4] : memref<1x96xf32, #tpu.memory_space<vmem>>, vector<1x96xf32>
    %5 = vector.broadcast %4 : vector<1x96xf32> to vector<128x96xf32>
    %6 = arith.addf %3, %5 : vector<128x96xf32>
    %cst_5 = arith.constant 0.000000e+00 : f32
    %7 = vector.broadcast %cst_5 : f32 to vector<128x96xf32>
    %8 = arith.maximumf %6, %7 : vector<128x96xf32>
    %9 = arith.truncf %8 : vector<128x96xf32> to vector<128x96xbf16>
    %c0_6 = arith.constant 0 : index
    %c0_7 = arith.constant 0 : index
    %10 = vector.load %arg4[%c0_6, %c0_7] : memref<96x32xbf16, #tpu.memory_space<vmem>>, vector<96x32xbf16>
    %cst_8 = arith.constant dense<0.000000e+00> : vector<128x32xf32>
    %11 = tpu.matmul %9, %10, %cst_8 {dimension_numbers = #tpu.dot_dimension_numbers<[1], [0], [0], [1], [0, 0, 1, 1], [], []>} : vector<128x96xbf16>, vector<96x32xbf16>, vector<128x32xf32> -> vector<128x32xf32>
    %c0_9 = arith.constant 0 : index
    %c0_10 = arith.constant 0 : index
    %12 = vector.load %arg5[%c0_9, %c0_10] : memref<1x32xf32, #tpu.memory_space<vmem>>, vector<1x32xf32>
    %13 = vector.broadcast %12 : vector<1x32xf32> to vector<128x32xf32>
    %14 = arith.addf %11, %13 : vector<128x32xf32>
    %15 = arith.negf %14 : vector<128x32xf32>
    %16 = math.exp %15 : vector<128x32xf32>
    %cst_11 = arith.constant 1.000000e+00 : f32
    %17 = vector.broadcast %cst_11 : f32 to vector<128x32xf32>
    %18 = arith.addf %17, %16 : vector<128x32xf32>
    %19 = arith.divf %17, %18 : vector<128x32xf32>
    %20 = arith.mulf %19, %0 : vector<128x32xf32>
    %21 = arith.truncf %20 : vector<128x32xf32> to vector<128x32xbf16>
    %c0_12 = arith.constant 0 : index
    %c0_13 = arith.constant 0 : index
    %22 = vector.load %arg6[%c0_12, %c0_13] : memref<32x96xbf16, #tpu.memory_space<vmem>>, vector<32x96xbf16>
    %cst_14 = arith.constant dense<0.000000e+00> : vector<128x96xf32>
    %23 = tpu.matmul %21, %22, %cst_14 {dimension_numbers = #tpu.dot_dimension_numbers<[1], [0], [0], [1], [0, 0, 1, 1], [], []>} : vector<128x32xbf16>, vector<32x96xbf16>, vector<128x96xf32> -> vector<128x96xf32>
    %c0_15 = arith.constant 0 : index
    %c0_16 = arith.constant 0 : index
    %24 = vector.load %arg7[%c0_15, %c0_16] : memref<1x96xf32, #tpu.memory_space<vmem>>, vector<1x96xf32>
    %25 = vector.broadcast %24 : vector<1x96xf32> to vector<128x96xf32>
    %26 = arith.addf %23, %25 : vector<128x96xf32>
    %cst_17 = arith.constant 0.000000e+00 : f32
    %27 = vector.broadcast %cst_17 : f32 to vector<128x96xf32>
    %28 = arith.maximumf %26, %27 : vector<128x96xf32>
    %29 = arith.truncf %28 : vector<128x96xf32> to vector<128x96xbf16>
    %c0_18 = arith.constant 0 : index
    %c0_19 = arith.constant 0 : index
    %30 = vector.load %arg8[%c0_18, %c0_19] : memref<96x32xbf16, #tpu.memory_space<vmem>>, vector<96x32xbf16>
    %cst_20 = arith.constant dense<0.000000e+00> : vector<128x32xf32>
    %31 = tpu.matmul %29, %30, %cst_20 {dimension_numbers = #tpu.dot_dimension_numbers<[1], [0], [0], [1], [0, 0, 1, 1], [], []>} : vector<128x96xbf16>, vector<96x32xbf16>, vector<128x32xf32> -> vector<128x32xf32>
    %c0_21 = arith.constant 0 : index
    %c0_22 = arith.constant 0 : index
    %32 = vector.load %arg9[%c0_21, %c0_22] : memref<1x32xf32, #tpu.memory_space<vmem>>, vector<1x32xf32>
    %33 = vector.broadcast %32 : vector<1x32xf32> to vector<128x32xf32>
    %34 = arith.addf %31, %33 : vector<128x32xf32>
    %35 = arith.addf %34, %20 : vector<128x32xf32>
    %36 = arith.truncf %35 : vector<128x32xf32> to vector<128x32xbf16>
    %c0_23 = arith.constant 0 : index
    %c0_24 = arith.constant 0 : index
    %37 = vector.load %arg10[%c0_23, %c0_24] : memref<32x128xbf16, #tpu.memory_space<vmem>>, vector<32x128xbf16>
    %cst_25 = arith.constant dense<0.000000e+00> : vector<128x128xf32>
    %38 = tpu.matmul %36, %37, %cst_25 {dimension_numbers = #tpu.dot_dimension_numbers<[1], [0], [0], [1], [0, 0, 1, 1], [], []>} : vector<128x32xbf16>, vector<32x128xbf16>, vector<128x128xf32> -> vector<128x128xf32>
    %c0_26 = arith.constant 0 : index
    %c0_27 = arith.constant 0 : index
    %39 = vector.load %arg11[%c0_26, %c0_27] : memref<1x128xf32, #tpu.memory_space<vmem>>, vector<1x128xf32>
    %40 = vector.broadcast %39 : vector<1x128xf32> to vector<128x128xf32>
    %41 = arith.addf %38, %40 : vector<128x128xf32>
    %c0_28 = arith.constant 0 : index
    %c0_29 = arith.constant 0 : index
    %42 = vector.load %arg12[%c0_28, %c0_29] : memref<128x128xf32, #tpu.memory_space<vmem>>, vector<128x128xf32>
    tpu.vector_store %arg12[%c0_28, %c0_29], %41 {strides = array<i32>} : memref<128x128xf32, #tpu.memory_space<vmem>>, vector<128x128xf32>,
    return
  }
  func.func @transform_0(%arg0: i32) -> (i32, i32) {
    %c0_i32 = arith.constant 0 : i32
    %c0_i32_0 = arith.constant 0 : i32
    return %arg0, %c0_i32 : i32, i32
  }
  func.func @transform_1(%arg0: i32) -> (i32, i32) {
    %c0_i32 = arith.constant 0 : i32
    %c0_i32_0 = arith.constant 0 : i32
    %c0_i32_1 = arith.constant 0 : i32
    return %c0_i32, %c0_i32_0 : i32, i32
  }
  func.func @transform_2(%arg0: i32) -> (i32, i32) {
    %c0_i32 = arith.constant 0 : i32
    %c0_i32_0 = arith.constant 0 : i32
    %c0_i32_1 = arith.constant 0 : i32
    return %c0_i32, %c0_i32_0 : i32, i32
  }
  func.func @transform_3(%arg0: i32) -> (i32, i32) {
    %c0_i32 = arith.constant 0 : i32
    %c0_i32_0 = arith.constant 0 : i32
    %c0_i32_1 = arith.constant 0 : i32
    return %c0_i32, %c0_i32_0 : i32, i32
  }
  func.func @transform_4(%arg0: i32) -> (i32, i32) {
    %c0_i32 = arith.constant 0 : i32
    %c0_i32_0 = arith.constant 0 : i32
    %c0_i32_1 = arith.constant 0 : i32
    return %c0_i32, %c0_i32_0 : i32, i32
  }
  func.func @transform_5(%arg0: i32) -> (i32, i32) {
    %c0_i32 = arith.constant 0 : i32
    %c0_i32_0 = arith.constant 0 : i32
    %c0_i32_1 = arith.constant 0 : i32
    return %c0_i32, %c0_i32_0 : i32, i32
  }
  func.func @transform_6(%arg0: i32) -> (i32, i32) {
    %c0_i32 = arith.constant 0 : i32
    %c0_i32_0 = arith.constant 0 : i32
    %c0_i32_1 = arith.constant 0 : i32
    return %c0_i32, %c0_i32_0 : i32, i32
  }
  func.func @transform_7(%arg0: i32) -> (i32, i32) {
    %c0_i32 = arith.constant 0 : i32
    %c0_i32_0 = arith.constant 0 : i32
    %c0_i32_1 = arith.constant 0 : i32
    return %c0_i32, %c0_i32_0 : i32, i32
  }
  func.func @transform_8(%arg0: i32) -> (i32, i32) {
    %c0_i32 = arith.constant 0 : i32
    %c0_i32_0 = arith.constant 0 : i32
    %c0_i32_1 = arith.constant 0 : i32
    return %c0_i32, %c0_i32_0 : i32, i32
  }
  func.func @transform_9(%arg0: i32) -> (i32, i32) {
    %c0_i32 = arith.constant 0 : i32
    %c0_i32_0 = arith.constant 0 : i32
    %c0_i32_1 = arith.constant 0 : i32
    return %c0_i32, %c0_i32_0 : i32, i32
  }
  func.func @transform_10(%arg0: i32) -> (i32, i32) {
    %c0_i32 = arith.constant 0 : i32
    %c0_i32_0 = arith.constant 0 : i32
    %c0_i32_1 = arith.constant 0 : i32
    return %c0_i32, %c0_i32_0 : i32, i32
  }
  func.func @transform_11(%arg0: i32) -> (i32, i32) {
    %c0_i32 = arith.constant 0 : i32
    %c0_i32_0 = arith.constant 0 : i32
    return %arg0, %c0_i32 : i32, i32
  }
}

</mosaic_0001>

<bundles_post_ra>
// kernel: tpu_custom_call.1
= control target key start
LH: loop header
LB: loop body
LE: loop exit
PB: predicated region body
PF: predicated region fallthrough
CT: control target
= control target key end

     0   :  { %16 = vsyncpa [#allocation3], 0  ;;  %s2437_s0 = inlined_call_operand.vmem [shape: f32[256,32], index: 0, kind: input, shape index: {}]   ;;  %s2438_s1 = inlined_call_operand.vmem [shape: bf16[32,96], index: 1, kind: input, shape index: {}]   ;;  %s2439_s2 = inlined_call_operand.vmem [shape: f32[1,96], index: 2, kind: input, shape index: {}]   ;;  %s2440_s3 = inlined_call_operand.vmem [shape: bf16[96,32], index: 3, kind: input, shape index: {}]   ;;  %s2441_s4 = inlined_call_operand.vmem [shape: f32[1,32], index: 4, kind: input, shape index: {}]   ;;  %s2442_s5 = inlined_call_operand.vmem [shape: bf16[32,96], index: 5, kind: input, shape index: {}]   ;;  %s2443_s6 = inlined_call_operand.vmem [shape: f32[1,96], index: 6, kind: input, shape index: {}]   ;;  %s2444_s7 = inlined_call_operand.vmem [shape: bf16[96,32], index: 7, kind: input, shape index: {}]   ;;  %s2445_s8 = inlined_call_operand.vmem [shape: f32[1,32], index: 8, kind: input, shape index: {}]   ;;  %s2446_s9 = inlined_call_operand.vmem [shape: bf16[32,128], index: 9, kind: input, shape index: {}]   ;;  %s2447_s10 = inlined_call_operand.vmem [shape: f32[1,128], index: 10, kind: input, shape index: {}]   ;;  %s2448_s11 = inlined_call_operand.hbm [shape: f32[256,128], index: 11, kind: output, shape index: {}]  }
   0x1   :  { %18 = vsyncpa [#allocation3 + $0x1], 0  ;;  %s2015_s17 = smov 0   ;;  %s2017_s18 = smov 0  }
   0x2   :  { %s2019_s19 = smov 0   ;;  %s2021_s20 = smov 0  }
   0x3 LB: > { %s2036_s21 = sadd.s32 4294967295, %s1950_s20   ;;  %s1483_s22 = sadd.s32 4294967294, %s1950_s20   ;;  %s1950_s20 = sphi %s2021_s20, %s2454_s20   ;;  %s1946_s19 = sphi %s2019_s19, %s2453_s19   ;;  %s1942_s18 = sphi %s2017_s18, %s2452_s18   ;;  %s1938_s17 = sphi %s2015_s17, %s2451_s17  }
   0x4   : > { %s2040_s23 = sadd.s32 1, %s1950_s20   ;;  %s267_s24 = sadd.s32 1, %s1946_s19 }
   0x5   : > { %s264_s25 = ssub.s32 %s1950_s20, %s2040_s23  ;;  %p277_p0 = scmp.ne.s32.totalorder %s1946_s19, %s1942_s18 }
   0x6   : > { %p265_p1 = scmp.eq.s32.totalorder %s264_s25, 0  ;;  %p278_p2 = scmp.eq.s32.totalorder %s2036_s21, 1 }
   0x7   : > { %p283_p3 = scmp.ne.s32.totalorder %s1942_s18, %s1938_s17  ;;  %p284_p4 = scmp.eq.s32.totalorder %s1483_s22, 1 }
   0x8   : > { %s2051_s26 = scalar_select %p265_p1, %s1946_s19, %s267_s24  }
   0x9   : > { %p2053_p5 = por %p278_p2, %p277_p0  ;;  %p2057_p6 = por %p284_p4, %p283_p3 }
   0xa   : > { %p1486_p7 = scmp.ge.s32.totalorder %s1950_s20, 1  ;;  %p341_p8 = scmp.lt.s32.totalorder %s1950_s20, 3 }
   0xc   : > { %p342_p9 = pnand %p1486_p7, %p341_p8 }
   0xd   : > { %v1806_v0 = vld [vmem:[%s2438_s1] sm:$0xff] (!%p342_p9)   ;;  %s1488_s12 = sshll.u32 (!%p342_p9), %s2036_s21, 4  ;;  %v1807_v1 = vld [vmem:[%s2438_s1 + $0x8] sm:$0xff] (!%p342_p9)   ;;  %vm436_vm0 = vcmask (!%p342_p9), 261120   ;;  %v1810_v23 = vld [vmem:[%s2440_s3 + $0x10] sm:$0xff] (!%p342_p9)   ;;  %vm637_vm1 = vcmask (!%p342_p9), 785408  }
   0xe   : > { %345 = sbr.rel (%p342_p9) target bundleno = 1199 (0x4af), region = 64  ;;  %p382_p10 = scmp.lt.s32.totalorder (!%p342_p9), %s1488_s12, 31  ;;  %1633 = vmatprep.subr.bf16.mxu0 (!%p342_p9), %v1806_v0  ;;  %1749 = vmatprep.subr.bf16.mxu1 (!%p342_p9), %v1806_v0  ;;  %v1808_v2 = vld [vmem:[%s2440_s3] sm:$0xff] (!%p342_p9)   ;;  %v1809_v17 = vld [vmem:[%s2440_s3 + $0x8] sm:$0xff] (!%p342_p9)   ;;  %v1811_v25 = vld [vmem:[%s2440_s3 + $0x18] sm:$0xff] (!%p342_p9)  }
   0xf   : > { %1634 = vmatpush3.bf16.msra.mxu0 (!%p342_p9), %v1806_v0  ;;  %1751 = vmatpush3.bf16.msra.mxu1 (!%p342_p9), %v1806_v0  ;;  %v1812_v30 = vld [vmem:[%s2440_s3 + $0x20] sm:$0xff] (!%p342_p9)   ;;  %v1813_v31 = vld [vmem:[%s2440_s3 + $0x28] sm:$0xff] (!%p342_p9)   ;;  %s378_s25 = sand.u32 (!%p342_p9), 1, %s1942_s18   ;;  %s1574_s14 = sshll.u32 (!%p342_p9), %s2036_s21, 11 }
  0x10   : > { %1635 = vmatprep.subr.bf16.mxu0 (!%p342_p9), %v1807_v1  ;;  %1750 = vmatprep.subr.bf16.mxu1 (!%p342_p9), %v1807_v1  ;;  %v1490_v32 = vld [vmem:[%s2439_s2] ss:$0 sm:$0xff] (!%p342_p9)  ;;  %s1487_s30 = sshll.u32 (!%p342_p9), %s378_s25, 7  ;;  %s2387_s24 = scalar_lea.hbm (!%p342_p9), %s2448_s11, %s1574_s14 }
  0x11   : > { %s2367_s13 = scalar_lea.vmem (!%p342_p9), [#allocation2], %s1487_s30  ;;  %s2396_s21 = scalar_lea.sflag (!%p342_p9), [#allocation3], %s378_s25 }
  0x12   : > { %s1421_s15 = sshll.u32 (!%p342_p9), %s2367_s13, 4  ;;  %s2389_s15 = int_to_ptr.vmem [resolvable:$true] %s1421_s15 }
  0x13   : > { %1636 = vmatpush3.bf16.msra.mxu0 (!%p342_p9), %v1807_v1  ;;  %1752 = vmatpush3.bf16.msra.mxu1 (!%p342_p9), %v1807_v1  ;;  %s1888_s30 = scalar_lea.vmem (!%p342_p9), %s2389_s15, 2048 }
  0x14   : > { %1653 = vmatprep.subr.bf16.mxu1 (!%p342_p9), %v1808_v2  ;;  %p1889_p11 = scmp.ne.s32.totalorder (!%p342_p9), %s2389_s15, %s1888_s30 }
  0x15   : > { %s2456_s12 = smov (!%p382_p10, %s1488_s12), 31 }
  0x16   : > { %s1489_s22 = sshll.u32 %s2456_s12, 3  ;;  %p1890_p12 = pnand %p1889_p11, %p2053_p5 }
  0x17   : > { %s2076_s29 = scalar_lea.vmem %s2437_s0, %s1489_s22 }
  0x18   : > { %v2079_v3 = vld [vmem:[%s2076_s29] sm:$0xff]  ;;  %v2082_v4 = vld [vmem:[%s2076_s29 + $0x8] sm:$0xff]  ;;  %v2085_v5 = vld [vmem:[%s2076_s29 + $0x10] sm:$0xff]  ;;  %p1891_p13 = pneg %p1890_p12 }
  0x19   : > { %v405_v6 = vpack.c.bf16 %v2082_v4, %v2079_v3  ;;  %v2090_v7 = vld [vmem:[%s2076_s29 + $0x18] sm:$0xff]  ;;  %v2093_v8 = vld [vmem:[%s2076_s29 + $0x20] sm:$0xff]  ;;  %v2096_v9 = vld [vmem:[%s2076_s29 + $0x28] sm:$0xff] }
  0x1a   : > { %v406_v10 = vpack.c.bf16 %v2090_v7, %v2085_v5  ;;  %v407_v11 = vpack.c.bf16 %v2096_v9, %v2093_v8  ;;  %v2103_v12 = vld [vmem:[%s2076_s29 + $0x30] sm:$0xff]  ;;  %v2106_v13 = vld [vmem:[%s2076_s29 + $0x38] sm:$0xff]  ;;  %v2109_v14 = vld [vmem:[%s2076_s29 + $0x40] sm:$0xff] }
  0x1b   : > { %1637 = vmatprep.mubr.msk.bf16.mxu0 %vm436_vm0, %v405_v6  ;;  %v408_v15 = vpack.c.bf16 %v2106_v13, %v2103_v12  ;;  %v2115_v16 = vld [vmem:[%s2076_s29 + $0x48] sm:$0xff]  ;;  %v2125_v19 = vld [vmem:[%s2076_s29 + $0x50] sm:$0xff]  ;;  %v2128_v20 = vld [vmem:[%s2076_s29 + $0x58] sm:$0xff] }
  0x1c   : > { %1638 = vmatmul.mubr.msk.bf16.vlgmr.msra.gmra.mrb[0].mxu0 %vm436_vm0, %v406_v10  ;;  %1641 = vmatprep.mubr.msk.bf16.mxu1 %vm436_vm0, %v407_v11  ;;  %v409_v18 = vpack.c.bf16 %v2115_v16, %v2109_v14  ;;  %v2132_v21 = vld [vmem:[%s2076_s29 + $0x60] sm:$0xff]  ;;  %v2135_v22 = vld [vmem:[%s2076_s29 + $0x68] sm:$0xff]  ;;  %v410_v24 = vpack.c.bf16 %v2128_v20, %v2125_v19  ;;  %v2151_v27 = vld [vmem:[%s2076_s29 + $0x70] sm:$0xff] }
  0x1d   : > { %1642 = vmatmul.mubr.msk.bf16.vlgmr.msra.gmra.mrb[0].mxu1 %vm436_vm0, %v408_v15  ;;  %v411_v26 = vpack.c.bf16 %v2135_v22, %v2132_v21  ;;  %v2154_v28 = vld [vmem:[%s2076_s29 + $0x78] sm:$0xff]  ;;  %s1952_s29 = smov [#allocation2]  }
  0x1e   : > { %1645 = vmatprep.mubr.msk.bf16.mxu1 %vm436_vm0, %v409_v18  ;;  %1654 = vmatpush3.bf16.msra.mxu1 %v1808_v2  ;;  %v412_v29 = vpack.c.bf16 %v2154_v28, %v2151_v27  ;;  %s1892_s12 = sshll.u32 %s1952_s29, 4  ;;  %s1893_s12 = int_to_ptr.vmem [resolvable:$false] %s1892_s12 }
  0x1f   : > { %1655 = vmatprep.subr.bf16.mxu1 %v1809_v17  ;;  %s1894_s14 = scalar_lea.vmem %s1893_s12, 4096  ;;  %p1895_p0 = scmp.lt.s32.totalorder %s2389_s15, %s1893_s12 }
  0x20   : > { %p1896_p1 = scmp.lt.s32.totalorder %s1894_s14, %s1888_s30 }
  0x22   : > { %1656 = vmatpush3.bf16.msra.mxu1 %v1809_v17  ;;  %p1897_p2 = por %p1896_p1, %p1895_p0 }
  0x23   : > { %1657 = vmatprep.subr.bf16.mxu1 %v1810_v23 }
  0x24   : > { %p1898_p3 = pnand %p1897_p2, %p1891_p13 }
  0x25   : > { %1646 = vmatmul.mubr.msk.bf16.gmra.mrb[4].mxu1 %vm436_vm0, %v410_v24 }
  0x26   : > { %1649 = vmatprep.mubr.msk.bf16.mxu1 %vm436_vm0, %v411_v26  ;;  %1658 = vmatpush3.bf16.msra.mxu1 %v1810_v23 }
  0x27   : > { %1659 = vmatprep.subr.bf16.mxu1 %v1811_v25 }
  0x2a   : > { %1660 = vmatpush3.bf16.msra.mxu1 %v1811_v25 }
  0x2b   : > { %1661 = vmatprep.subr.bf16.mxu1 %v1812_v30 }
  0x2d   : > { %1650 = vmatmul.mubr.msk.bf16.gmra.mrb[8].mxu1 %vm436_vm0, %v412_v29 }
  0x2e   : > { %1662 = vmatpush3.bf16.msra.mxu1 %v1812_v30 }
  0x2f   : > { %1663 = vmatprep.subr.bf16.mxu1 %v1813_v31 }
  0x32   : > { %1664 = vmatpush3.bf16.msra.mxu1 %v1813_v31 }
  0xef   : > { %v1639_v33 = vpop.f32.mrb[0].mxu0 }
  0xf0   : > { %v504_v34 = vadd.f32 %v1639_v33, %v1490_v32  ;;  %v495_v35 = vpop.f32.mrb[1].mxu0  ;;  %v1643_v36 = vpop.f32.mrb[0].mxu1 }
  0xf1   : > { %v496_v37 = vadd.f32 %v1490_v32, %v495_v35  ;;  %v1640_v38 = vpop.f32.mrb[2].mxu0  ;;  %v520_v39 = vadd.f32 %v1643_v36, %v1490_v32  ;;  %v511_v40 = vpop.f32.mrb[1].mxu1 }
  0xf2   : > { %v507_v41 = vadd.f32 %v1640_v38, %v1490_v32  ;;  %v498_v42 = vpop.f32.mrb[3].mxu0  ;;  %v512_v43 = vadd.f32 %v1490_v32, %v511_v40  ;;  %v1644_v44 = vpop.f32.mrb[2].mxu1  ;;  %v560_v49 = vmax.f32 %v504_v34, 0.0 }
  0xf3   : > { %v499_v45 = vadd.f32 %v1490_v32, %v498_v42  ;;  %v564_v46 = vmax.f32 %v520_v39, 0.0  ;;  %v523_v47 = vadd.f32 %v1644_v44, %v1490_v32  ;;  %v514_v48 = vpop.f32.mrb[3].mxu1  ;;  %v558_v53 = vmax.f32 %v496_v37, 0.0  ;;  %v1814_v42 = vld [vmem:[%s2442_s5] sm:$0xff]   ;;  %v2191_v44 = vld [vmem:[%s2444_s7 + $0x8] sm:$0xff]  }
  0xf4   : > { %v561_v50 = vmax.f32 %v507_v41, 0.0  ;;  %v562_v51 = vmax.f32 %v512_v43, 0.0  ;;  %v515_v52 = vadd.f32 %v1490_v32, %v514_v48  ;;  %1681 = vmatprep.subr.bf16.mxu0 %v1814_v42  ;;  %v2185_v43 = vld [vmem:[%s2444_s7] sm:$0xff]  }
  0xf5   : > { %v559_v54 = vmax.f32 %v499_v45, 0.0  ;;  %v565_v55 = vmax.f32 %v523_v47, 0.0  ;;  %1682 = vmatpush3.bf16.msra.mxu0 %v1814_v42  ;;  %1753 = vmatprep.subr.bf16.mxu1 %v2185_v43  ;;  %v2199_v45 = vld [vmem:[%s2444_s7 + $0x10] sm:$0xff]   ;;  %v2214_v47 = vld [vmem:[%s2441_s4] ss:$0 sm:$0xff] }
  0xf6   : > { %v575_v56 = vpack.c.bf16 %v561_v50, %v560_v49  ;;  %v563_v57 = vmax.f32 %v515_v52, 0.0 }
  0xf7   : > { %v574_v58 = vpack.c.bf16 %v559_v54, %v558_v53  ;;  %v577_v59 = vpack.c.bf16 %v565_v55, %v564_v46  ;;  %v2206_v46 = vld [vmem:[%s2444_s7 + $0x18] sm:$0xff]  }
  0xf8   : > { %v576_v60 = vpack.c.bf16 %v563_v57, %v562_v51  ;;  %v1647_v61 = vpop.f32.mrb[4].mxu1 }
  0xf9   : > { %1665 = vmatprep.mubr.msk.bf16.mxu1 %vm637_vm1, %v574_v58  ;;  %v536_v62 = vadd.f32 %v1647_v61, %v1490_v32  ;;  %v527_v63 = vpop.f32.mrb[5].mxu1 }
  0xfa   : > { %1666 = vmatmul.mubr.msk.bf16.vlgmr.msra.gmra.mrb[12].mxu1 %vm637_vm1, %v575_v56  ;;  %v528_v0 = vadd.f32 %v1490_v32, %v527_v63  ;;  %v1648_v1 = vpop.f32.mrb[6].mxu1 }
  0xfb   : > { %v568_v2 = vmax.f32 %v536_v62, 0.0  ;;  %v539_v6 = vadd.f32 %v1648_v1, %v1490_v32  ;;  %1669 = vmatprep.mubr.msk.bf16.mxu1 %vm637_vm1, %v576_v60  ;;  %v530_v10 = vpop.f32.mrb[7].mxu1  ;;  %1759 = vmatpush3.bf16.msra.mxu1 %v2185_v43 }
  0xfc   : > { %v566_v11 = vmax.f32 %v528_v0, 0.0  ;;  %v531_v15 = vadd.f32 %v1490_v32, %v530_v10  ;;  %1754 = vmatprep.subr.bf16.mxu1 %v2191_v44 }
  0xfd   : > { %v569_v17 = vmax.f32 %v539_v6, 0.0 }
  0xfe   : > { %v567_v18 = vmax.f32 %v531_v15, 0.0 }
  0xff   : > { %v579_v23 = vpack.c.bf16 %v569_v17, %v568_v2  ;;  %1760 = vmatpush3.bf16.msra.mxu1 %v2191_v44 }
 0x100   : > { %v578_v24 = vpack.c.bf16 %v567_v18, %v566_v11  ;;  %v1651_v25 = vpop.f32.mrb[8].mxu1  ;;  %1755 = vmatprep.subr.bf16.mxu1 %v2199_v45 }
 0x101   : > { %v552_v26 = vadd.f32 %v1651_v25, %v1490_v32  ;;  %v543_v29 = vpop.f32.mrb[9].mxu1 }
 0x102   : > { %1670 = vmatmul.mubr.msk.bf16.gmra.mrb[16].mxu1 %vm637_vm1, %v577_v59  ;;  %v544_v30 = vadd.f32 %v1490_v32, %v543_v29  ;;  %v1652_v31 = vpop.f32.mrb[10].mxu1 }
 0x103   : > { %v572_v33 = vmax.f32 %v552_v26, 0.0  ;;  %v555_v34 = vadd.f32 %v1652_v31, %v1490_v32  ;;  %1673 = vmatprep.mubr.msk.bf16.mxu1 %vm637_vm1, %v578_v24  ;;  %v546_v35 = vpop.f32.mrb[11].mxu1  ;;  %1761 = vmatpush3.bf16.msra.mxu1 %v2199_v45 }
 0x104   : > { %v570_v36 = vmax.f32 %v544_v30, 0.0  ;;  %v547_v37 = vadd.f32 %v1490_v32, %v546_v35  ;;  %v1815_v32 = vld [vmem:[%s2442_s5 + $0x8] sm:$0xff]   ;;  %1756 = vmatprep.subr.bf16.mxu1 %v2206_v46 }
 0x105   : > { %v573_v38 = vmax.f32 %v555_v34, 0.0  ;;  %1683 = vmatprep.subr.bf16.mxu0 %v1815_v32 }
 0x106   : > { %v571_v39 = vmax.f32 %v547_v37, 0.0  ;;  %1684 = vmatpush3.bf16.msra.mxu0 %v1815_v32 }
 0x107   : > { %v581_v40 = vpack.c.bf16 %v573_v38, %v572_v33  ;;  %1701 = vmatprep.subr.bf16.mxu0 %v2185_v43  ;;  %1762 = vmatpush3.bf16.msra.mxu1 %v2206_v46 }
 0x108   : > { %v580_v41 = vpack.c.bf16 %v571_v39, %v570_v36 }
 0x10a   : > { %1674 = vmatmul.mubr.msk.bf16.gmra.mrb[20].mxu1 %vm637_vm1, %v579_v23 }
 0x10b   : > { %1677 = vmatprep.mubr.msk.bf16.mxu1 %vm637_vm1, %v580_v41 }
 0x112   : > { %1678 = vmatmul.mubr.msk.bf16.gmra.mrb[24].mxu1 %vm637_vm1, %v581_v40 }
 0x1cd   : > { %v1667_v48 = vpop.f32.mrb[12].mxu1 }
 0x1ce   : > { %v705_v49 = vadd.f32 %v1667_v48, %v2214_v47  ;;  %v696_v50 = vpop.f32.mrb[13].mxu1 }
 0x1cf   : > { %v697_v51 = vadd.f32 %v2214_v47, %v696_v50  ;;  %v1668_v52 = vpop.f32.mrb[14].mxu1 }
 0x1d0   : > { %v1518_v53 = vmul.f32 -1.442695, %v705_v49  ;;  %v708_v54 = vadd.f32 %v1668_v52, %v2214_v47  ;;  %v699_v55 = vpop.f32.mrb[15].mxu1 }
 0x1d1   : > { %v1516_v56 = vmul.f32 -1.442695, %v697_v51  ;;  %v700_v57 = vadd.f32 %v2214_v47, %v699_v55 }
 0x1d2   : > { %1824 = vpow2.f32 %v1518_v53  ;;  %v1519_v58 = vmul.f32 -1.442695, %v708_v54 }
 0x1d3   : > { %1826 = vpow2.f32 %v1516_v56  ;;  %v1517_v59 = vmul.f32 -1.442695, %v700_v57 }
 0x1d4   : > { %1828 = vpow2.f32 %v1519_v58 }
 0x1d5   : > { %1830 = vpow2.f32 %v1517_v59  ;;  %v1671_v60 = vpop.f32.mrb[16].mxu1 }
 0x1d6   : > { %v721_v61 = vadd.f32 %v1671_v60, %v2214_v47  ;;  %v712_v62 = vpop.f32.mrb[17].mxu1 }
 0x1d7   : > { %v713_v63 = vadd.f32 %v2214_v47, %v712_v62  ;;  %v1672_v0 = vpop.f32.mrb[18].mxu1 }
 0x1d8   : > { %v1522_v1 = vmul.f32 -1.442695, %v721_v61  ;;  %v724_v2 = vadd.f32 %v1672_v0, %v2214_v47  ;;  %v715_v6 = vpop.f32.mrb[19].mxu1 }
 0x1d9   : > { %v1520_v10 = vmul.f32 -1.442695, %v713_v63  ;;  %v716_v11 = vadd.f32 %v2214_v47, %v715_v6 }
 0x1da   : > { %1832 = vpow2.f32 %v1522_v1  ;;  %v1523_v15 = vmul.f32 -1.442695, %v724_v2 }
 0x1db   : > { %1834 = vpow2.f32 %v1520_v10  ;;  %v1521_v17 = vmul.f32 -1.442695, %v716_v11 }
 0x1dc   : > { %v1825_v18 = vpop.eup %1824  ;;  %1836 = vpow2.f32 %v1523_v15 }
 0x1dd   : > { %v1827_v23 = vpop.eup %1826  ;;  %v809_v24 = vadd.f32 1.0, %v1825_v18  ;;  %1838 = vpow2.f32 %v1521_v17  ;;  %v1675_v25 = vpop.f32.mrb[20].mxu1 }
 0x1de   : > { %v1829_v26 = vpop.eup %1828  ;;  %v807_v29 = vadd.f32 1.0, %v1827_v23  ;;  %v737_v30 = vadd.f32 %v1675_v25, %v2214_v47  ;;  %v728_v31 = vpop.f32.mrb[21].mxu1 }
 0x1df   : > { %v1831_v33 = vpop.eup %1830  ;;  %1840 = vrcp.f32 %v809_v24  ;;  %v810_v34 = vadd.f32 1.0, %v1829_v26  ;;  %v729_v35 = vadd.f32 %v2214_v47, %v728_v31  ;;  %v1676_v36 = vpop.f32.mrb[22].mxu1 }
 0x1e0   : > { %1842 = vrcp.f32 %v807_v29  ;;  %v808_v37 = vadd.f32 1.0, %v1831_v33  ;;  %v1526_v38 = vmul.f32 -1.442695, %v737_v30  ;;  %v740_v39 = vadd.f32 %v1676_v36, %v2214_v47  ;;  %v731_v40 = vpop.f32.mrb[23].mxu1 }
 0x1e1   : > { %1844 = vrcp.f32 %v810_v34  ;;  %v1524_v41 = vmul.f32 -1.442695, %v729_v35  ;;  %v732_v42 = vadd.f32 %v2214_v47, %v731_v40 }
 0x1e2   : > { %1846 = vrcp.f32 %v808_v37  ;;  %v1527_v32 = vmul.f32 -1.442695, %v740_v39 }
 0x1e3   : > { %1848 = vpow2.f32 %v1526_v38  ;;  %v1525_v48 = vmul.f32 -1.442695, %v732_v42 }
 0x1e4   : > { %v1833_v49 = vpop.eup %1832  ;;  %1850 = vpow2.f32 %v1524_v41 }
 0x1e5   : > { %v1835_v50 = vpop.eup %1834  ;;  %v813_v51 = vadd.f32 1.0, %v1833_v49  ;;  %1852 = vpow2.f32 %v1527_v32  ;;  %v1679_v52 = vpop.f32.mrb[24].mxu1 }
 0x1e6   : > { %v1837_v53 = vpop.eup %1836  ;;  %v811_v54 = vadd.f32 1.0, %v1835_v50  ;;  %1854 = vpow2.f32 %v1525_v48  ;;  %v753_v55 = vadd.f32 %v1679_v52, %v2214_v47  ;;  %v744_v56 = vpop.f32.mrb[25].mxu1 }
 0x1e7   : > { %v1839_v57 = vpop.eup %1838  ;;  %1856 = vrcp.f32 %v813_v51  ;;  %v814_v58 = vadd.f32 1.0, %v1837_v53  ;;  %v745_v59 = vadd.f32 %v2214_v47, %v744_v56  ;;  %v1680_v60 = vpop.f32.mrb[26].mxu1 }
 0x1e8   : > { %1858 = vrcp.f32 %v811_v54  ;;  %v812_v61 = vadd.f32 1.0, %v1839_v57  ;;  %v1530_v62 = vmul.f32 -1.442695, %v753_v55  ;;  %v756_v63 = vadd.f32 %v1680_v60, %v2214_v47  ;;  %v747_v0 = vpop.f32.mrb[27].mxu1 }
 0x1e9   : > { %v1841_v1 = vpop.eup %1840  ;;  %1860 = vrcp.f32 %v814_v58  ;;  %v1528_v2 = vmul.f32 -1.442695, %v745_v59  ;;  %v748_v6 = vadd.f32 %v2214_v47, %v747_v0 }
 0x1ea   : > { %v1843_v10 = vpop.eup %1842  ;;  %1862 = vrcp.f32 %v812_v61  ;;  %v1531_v11 = vmul.f32 -1.442695, %v756_v63  ;;  %v2242_v30 = vmul.f32 %v1841_v1, %v2085_v5 }
 0x1eb   : > { %v1845_v15 = vpop.eup %1844  ;;  %1864 = vpow2.f32 %v1530_v62  ;;  %v1529_v17 = vmul.f32 -1.442695, %v748_v6  ;;  %v2236_v25 = vmul.f32 %v1843_v10, %v2079_v3 }
 0x1ec   : > { %v1847_v18 = vpop.eup %1846  ;;  %1866 = vpow2.f32 %v1528_v2  ;;  %v2233_v23 = vmul.f32 %v1845_v15, %v2090_v7 }
 0x1ed   : > { %v1849_v24 = vpop.eup %1848  ;;  %1868 = vpow2.f32 %v1531_v11  ;;  %v2239_v26 = vmul.f32 %v1847_v18, %v2082_v4 }
 0x1ee   : > { %v1851_v47 = vpop.eup %1850  ;;  %v817_v29 = vadd.f32 1.0, %v1849_v24  ;;  %1870 = vpow2.f32 %v1529_v17  ;;  %v872_v3 = vpack.c.bf16 %v2233_v23, %v2242_v30 }
 0x1ef   : > { %v1853_v31 = vpop.eup %1852  ;;  %v815_v33 = vadd.f32 1.0, %v1851_v47  ;;  %v871_v7 = vpack.c.bf16 %v2239_v26, %v2236_v25 }
 0x1f0   : > { %v1855_v34 = vpop.eup %1854  ;;  %1872 = vrcp.f32 %v817_v29  ;;  %v818_v35 = vadd.f32 1.0, %v1853_v31 }
 0x1f1   : > { %v1857_v36 = vpop.eup %1856  ;;  %1874 = vrcp.f32 %v815_v33  ;;  %v816_v4 = vadd.f32 1.0, %v1855_v34  ;;  %1685 = vmatprep.mubr.msk.bf16.mxu0 %vm436_vm0, %v871_v7 }
 0x1f2   : > { %v1859_v37 = vpop.eup %1858  ;;  %1876 = vrcp.f32 %v818_v35  ;;  %1686 = vmatmul.mubr.msk.bf16.vlgmr.msra.gmra.mrb[4].mxu0 %vm436_vm0, %v872_v3  ;;  %v2262_v49 = vmul.f32 %v1857_v36, %v2103_v12 }
 0x1f3   : > { %v1861_v5 = vpop.eup %1860  ;;  %1878 = vrcp.f32 %v816_v4  ;;  %1702 = vmatpush3.bf16.msra.mxu0 %v2185_v43  ;;  %v2256_v41 = vmul.f32 %v1859_v37, %v2093_v8 }
 0x1f4   : > { %v1863_v38 = vpop.eup %1862  ;;  %v2252_v39 = vmul.f32 %v1861_v5, %v2106_v13  ;;  %1703 = vmatprep.subr.bf16.mxu0 %v2191_v44 }
 0x1f5   : > { %v1865_v40 = vpop.eup %1864  ;;  %v2259_v42 = vmul.f32 %v1863_v38, %v2096_v9 }
 0x1f6   : > { %v1867_v32 = vpop.eup %1866  ;;  %v821_v48 = vadd.f32 1.0, %v1865_v40  ;;  %v874_v8 = vpack.c.bf16 %v2252_v39, %v2262_v49 }
 0x1f7   : > { %v1869_v50 = vpop.eup %1868  ;;  %v819_v43 = vadd.f32 1.0, %v1867_v32  ;;  %v873_v13 = vpack.c.bf16 %v2259_v42, %v2256_v41  ;;  %1704 = vmatpush3.bf16.msra.mxu0 %v2191_v44 }
 0x1f8   : > { %v1871_v51 = vpop.eup %1870  ;;  %1880 = vrcp.f32 %v821_v48  ;;  %v822_v52 = vadd.f32 1.0, %v1869_v50  ;;  %1705 = vmatprep.subr.bf16.mxu0 %v2199_v45 }
 0x1f9   : > { %1882 = vrcp.f32 %v819_v43  ;;  %v820_v9 = vadd.f32 1.0, %v1871_v51  ;;  %1689 = vmatprep.mubr.msk.bf16.mxu0 %vm436_vm0, %v873_v13 }
 0x1fa   : > { %v1873_v12 = vpop.eup %1872  ;;  %1884 = vrcp.f32 %v822_v52  ;;  %1690 = vmatmul.mubr.msk.bf16.gmra.mrb[8].mxu0 %vm436_vm0, %v874_v8 }
 0x1fb   : > { %v1875_v53 = vpop.eup %1874  ;;  %1886 = vrcp.f32 %v820_v9  ;;  %1706 = vmatpush3.bf16.msra.mxu0 %v2199_v45  ;;  %v2284_v58 = vmul.f32 %v1873_v12, %v2125_v19 }
 0x1fc   : > { %v1877_v44 = vpop.eup %1876  ;;  %1707 = vmatprep.subr.bf16.mxu0 %v2206_v46  ;;  %v2278_v56 = vmul.f32 %v1875_v53, %v2109_v14 }
 0x1fd   : > { %v1879_v54 = vpop.eup %1878  ;;  %v2275_v55 = vmul.f32 %v1877_v44, %v2128_v20 }
 0x1fe   : > { %v2281_v57 = vmul.f32 %v1879_v54, %v2115_v16 }
 0x1ff   : > { %1708 = vmatpush3.bf16.msra.mxu0 %v2206_v46  ;;  %v876_v59 = vpack.c.bf16 %v2275_v55, %v2284_v58 }
 0x200   : > { %v875_v45 = vpack.c.bf16 %v2281_v57, %v2278_v56 }
 0x202   : > { %v1881_v60 = vpop.eup %1880  ;;  %1693 = vmatprep.mubr.msk.bf16.mxu0 %vm436_vm0, %v875_v45 }
 0x203   : > { %v1883_v20 = vpop.eup %1882  ;;  %1694 = vmatmul.mubr.msk.bf16.gmra.mrb[12].mxu0 %vm436_vm0, %v876_v59  ;;  %v2303_v62 = vmul.f32 %v1881_v60, %v2151_v27  ;;  %v1532_v27 = vld [vmem:[%s2443_s6] ss:$0 sm:$0xff] }
 0x204   : > { %v1885_v14 = vpop.eup %1884  ;;  %v2297_v19 = vmul.f32 %v1883_v20, %v2132_v21  ;;  %v1820_v21 = vld [vmem:[%s2444_s7 + $0x20] sm:$0xff]  }
 0x205   : > { %v1887_v16 = vpop.eup %1886  ;;  %v2294_v61 = vmul.f32 %v1885_v14, %v2154_v28  ;;  %1709 = vmatprep.subr.bf16.mxu0 %v1820_v21  ;;  %1757 = vmatprep.subr.bf16.mxu1 %v1820_v21 }
 0x206   : > { %v2300_v46 = vmul.f32 %v1887_v16, %v2135_v22  ;;  %1710 = vmatpush3.bf16.msra.mxu0 %v1820_v21  ;;  %1763 = vmatpush3.bf16.msra.mxu1 %v1820_v21  ;;  %v1821_v22 = vld [vmem:[%s2444_s7 + $0x28] sm:$0xff]  }
 0x207   : > { %v878_v0 = vpack.c.bf16 %v2294_v61, %v2303_v62  ;;  %1711 = vmatprep.subr.bf16.mxu0 %v1821_v22  ;;  %1758 = vmatprep.subr.bf16.mxu1 %v1821_v22 }
 0x208   : > { %v877_v63 = vpack.c.bf16 %v2300_v46, %v2297_v19 }
 0x20a   : > { %1697 = vmatprep.mubr.msk.bf16.mxu0 %vm436_vm0, %v877_v63  ;;  %1712 = vmatpush3.bf16.msra.mxu0 %v1821_v22 }
 0x20b   : > { %1698 = vmatmul.mubr.msk.bf16.gmra.mrb[16].mxu0 %vm436_vm0, %v878_v0  ;;  %1764 = vmatpush3.bf16.msra.mxu1 %v1821_v22 }
 0x2c5   : > { %v1687_v28 = vpop.f32.mrb[4].mxu0 }
 0x2c6   : > { %v969_v1 = vadd.f32 %v1687_v28, %v1532_v27  ;;  %v960_v2 = vpop.f32.mrb[5].mxu0 }
 0x2c7   : > { %v961_v6 = vadd.f32 %v1532_v27, %v960_v2  ;;  %v1688_v10 = vpop.f32.mrb[6].mxu0 }
 0x2c8   : > { %v972_v11 = vadd.f32 %v1688_v10, %v1532_v27  ;;  %v963_v15 = vpop.f32.mrb[7].mxu0  ;;  %v1025_v18 = vmax.f32 %v969_v1, 0.0 }
 0x2c9   : > { %v964_v17 = vadd.f32 %v1532_v27, %v963_v15  ;;  %v1023_v47 = vmax.f32 %v961_v6, 0.0 }
 0x2ca   : > { %v1026_v24 = vmax.f32 %v972_v11, 0.0 }
 0x2cb   : > { %v1024_v29 = vmax.f32 %v964_v17, 0.0 }
 0x2cc   : > { %v1040_v31 = vpack.c.bf16 %v1026_v24, %v1025_v18  ;;  %v1822_v24 = vld [vmem:[%s2446_s9] sm:$0xff]  }
 0x2cd   : > { %v1039_v33 = vpack.c.bf16 %v1024_v29, %v1023_v47  ;;  %v1691_v7 = vpop.f32.mrb[8].mxu0  ;;  %1729 = vmatprep.subr.bf16.mxu0 %v1822_v24  ;;  %v1543_v47 = vld [vmem:[%s2445_s8] ss:$0 sm:$0xff] }
 0x2ce   : > { %v985_v34 = vadd.f32 %v1691_v7, %v1532_v27  ;;  %v976_v35 = vpop.f32.mrb[9].mxu0 }
 0x2cf   : > { %v977_v3 = vadd.f32 %v1532_v27, %v976_v35  ;;  %v1692_v36 = vpop.f32.mrb[10].mxu0  ;;  %1713 = vmatprep.mubr.msk.bf16.mxu0 %vm637_vm1, %v1039_v33 }
 0x2d0   : > { %v988_v4 = vadd.f32 %v1692_v36, %v1532_v27  ;;  %v979_v37 = vpop.f32.mrb[11].mxu0  ;;  %1714 = vmatmul.mubr.msk.bf16.vlgmr.msra.gmra.mrb[20].mxu0 %vm637_vm1, %v1040_v31  ;;  %v1029_v38 = vmax.f32 %v985_v34, 0.0 }
 0x2d1   : > { %v980_v5 = vadd.f32 %v1532_v27, %v979_v37  ;;  %v1027_v32 = vmax.f32 %v977_v3, 0.0  ;;  %1730 = vmatpush3.bf16.msra.mxu0 %v1822_v24 }
 0x2d2   : > { %v1030_v40 = vmax.f32 %v988_v4, 0.0 }
 0x2d3   : > { %v1028_v48 = vmax.f32 %v980_v5, 0.0 }
 0x2d4   : > { %v1042_v50 = vpack.c.bf16 %v1030_v40, %v1029_v38 }
 0x2d5   : > { %v1041_v43 = vpack.c.bf16 %v1028_v48, %v1027_v32 }
 0x2d6   : > { %v1695_v13 = vpop.f32.mrb[12].mxu0 }
 0x2d7   : > { %v1001_v51 = vadd.f32 %v1695_v13, %v1532_v27  ;;  %v992_v52 = vpop.f32.mrb[13].mxu0  ;;  %1717 = vmatprep.mubr.msk.bf16.mxu1 %vm637_vm1, %v1041_v43 }
 0x2d8   : > { %v993_v8 = vadd.f32 %v1532_v27, %v992_v52  ;;  %v1696_v9 = vpop.f32.mrb[14].mxu0  ;;  %1718 = vmatmul.mubr.msk.bf16.vlgmr.msra.gmra.mrb[28].mxu1 %vm637_vm1, %v1042_v50 }
 0x2d9   : > { %v1004_v12 = vadd.f32 %v1696_v9, %v1532_v27  ;;  %v995_v53 = vpop.f32.mrb[15].mxu0  ;;  %v1033_v54 = vmax.f32 %v1001_v51, 0.0 }
 0x2da   : > { %v996_v44 = vadd.f32 %v1532_v27, %v995_v53  ;;  %v1031_v59 = vmax.f32 %v993_v8, 0.0 }
 0x2db   : > { %v1034_v45 = vmax.f32 %v1004_v12, 0.0 }
 0x2dc   : > { %v1032_v60 = vmax.f32 %v996_v44, 0.0 }
 0x2dd   : > { %v1044_v20 = vpack.c.bf16 %v1034_v45, %v1033_v54 }
 0x2de   : > { %v1043_v14 = vpack.c.bf16 %v1032_v60, %v1031_v59  ;;  %v1699_v16 = vpop.f32.mrb[16].mxu0 }
 0x2df   : > { %v1017_v63 = vadd.f32 %v1699_v16, %v1532_v27  ;;  %v1008_v0 = vpop.f32.mrb[17].mxu0 }
 0x2e0   : > { %v1009_v21 = vadd.f32 %v1532_v27, %v1008_v0  ;;  %v1700_v22 = vpop.f32.mrb[18].mxu0  ;;  %1721 = vmatprep.mubr.msk.bf16.mxu1 %vm637_vm1, %v1043_v14 }
 0x2e1   : > { %v1020_v28 = vadd.f32 %v1700_v22, %v1532_v27  ;;  %v1011_v1 = vpop.f32.mrb[19].mxu0  ;;  %1722 = vmatmul.mubr.msk.bf16.gmra.mrb[32].mxu1 %vm637_vm1, %v1044_v20  ;;  %v1037_v6 = vmax.f32 %v1017_v63, 0.0 }
 0x2e2   : > { %v1012_v2 = vadd.f32 %v1532_v27, %v1011_v1  ;;  %v1035_v11 = vmax.f32 %v1009_v21, 0.0  ;;  %v1823_v27 = vld [vmem:[%s2446_s9 + $0x8] sm:$0xff]  }
 0x2e3   : > { %v1038_v10 = vmax.f32 %v1020_v28, 0.0  ;;  %1731 = vmatprep.subr.bf16.mxu0 %v1823_v27 }
 0x2e4   : > { %v1036_v15 = vmax.f32 %v1012_v2, 0.0  ;;  %1732 = vmatpush3.bf16.msra.mxu0 %v1823_v27 }
 0x2e5   : > { %v1046_v17 = vpack.c.bf16 %v1038_v10, %v1037_v6 }
 0x2e6   : > { %v1045_v18 = vpack.c.bf16 %v1036_v15, %v1035_v11 }
 0x2e8   : > { %1725 = vmatprep.mubr.msk.bf16.mxu1 %vm637_vm1, %v1045_v18  ;;  %v1558_v18 = vld [vmem:[%s2447_s10] ss:$0 sm:$0xff] }
 0x2e9   : > { %1726 = vmatmul.mubr.msk.bf16.gmra.mrb[36].mxu1 %vm637_vm1, %v1046_v17 }
 0x3a3   : > { %v1715_v29 = vpop.f32.mrb[20].mxu0 }
 0x3a4   : > { %v1169_v31 = vadd.f32 %v1715_v29, %v1543_v47  ;;  %v1160_v33 = vpop.f32.mrb[21].mxu0 }
 0x3a5   : > { %v1161_v7 = vadd.f32 %v1543_v47, %v1160_v33  ;;  %v1716_v34 = vpop.f32.mrb[22].mxu0 }
 0x3a6   : > { %v1172_v35 = vadd.f32 %v1716_v34, %v1543_v47  ;;  %v1163_v3 = vpop.f32.mrb[23].mxu0  ;;  %v1225_v4 = vadd.f32 %v1169_v31, %v2242_v30 }
 0x3a7   : > { %v1164_v36 = vadd.f32 %v1543_v47, %v1163_v3  ;;  %v1223_v5 = vadd.f32 %v1161_v7, %v2236_v25 }
 0x3a8   : > { %v1226_v37 = vadd.f32 %v1172_v35, %v2233_v23 }
 0x3a9   : > { %v1224_v38 = vadd.f32 %v1164_v36, %v2239_v26 }
 0x3aa   : > { %v1240_v40 = vpack.c.bf16 %v1226_v37, %v1225_v4 }
 0x3ab   : > { %v1239_v32 = vpack.c.bf16 %v1224_v38, %v1223_v5  ;;  %v1719_v48 = vpop.f32.mrb[28].mxu1 }
 0x3ac   : > { %v1185_v50 = vadd.f32 %v1719_v48, %v1543_v47  ;;  %v1176_v43 = vpop.f32.mrb[29].mxu1 }
 0x3ad   : > { %v1177_v13 = vadd.f32 %v1543_v47, %v1176_v43  ;;  %v1720_v51 = vpop.f32.mrb[30].mxu1  ;;  %1733 = vmatprep.mubr.msk.bf16.mxu0 %vm436_vm0, %v1239_v32 }
 0x3ae   : > { %v1188_v52 = vadd.f32 %v1720_v51, %v1543_v47  ;;  %v1179_v8 = vpop.f32.mrb[31].mxu1  ;;  %1734 = vmatmul.mubr.msk.bf16.vlgmr.msra.gmra.mrb[24].mxu0 %vm436_vm0, %v1240_v40  ;;  %v1229_v23 = vadd.f32 %v1185_v50, %v2262_v49 }
 0x3af   : > { %v1180_v30 = vadd.f32 %v1543_v47, %v1179_v8  ;;  %v1227_v26 = vadd.f32 %v1177_v13, %v2256_v41 }
 0x3b0   : > { %v1230_v25 = vadd.f32 %v1188_v52, %v2252_v39 }
 0x3b1   : > { %v1228_v9 = vadd.f32 %v1180_v30, %v2259_v42 }
 0x3b2   : > { %v1242_v12 = vpack.c.bf16 %v1230_v25, %v1229_v23 }
 0x3b3   : > { %v1241_v53 = vpack.c.bf16 %v1228_v9, %v1227_v26 }
 0x3b4   : > { %v1723_v44 = vpop.f32.mrb[32].mxu1 }
 0x3b5   : > { %v1201_v54 = vadd.f32 %v1723_v44, %v1543_v47  ;;  %v1192_v45 = vpop.f32.mrb[33].mxu1  ;;  %1737 = vmatprep.mubr.msk.bf16.mxu0 %vm436_vm0, %v1241_v53 }
 0x3b6   : > { %v1193_v59 = vadd.f32 %v1543_v47, %v1192_v45  ;;  %v1724_v60 = vpop.f32.mrb[34].mxu1  ;;  %1738 = vmatmul.mubr.msk.bf16.gmra.mrb[28].mxu0 %vm436_vm0, %v1242_v12 }
 0x3b7   : > { %v1204_v20 = vadd.f32 %v1724_v60, %v1543_v47  ;;  %v1195_v14 = vpop.f32.mrb[35].mxu1  ;;  %v1233_v39 = vadd.f32 %v1201_v54, %v2284_v58 }
 0x3b8   : > { %v1196_v49 = vadd.f32 %v1543_v47, %v1195_v14  ;;  %v1231_v42 = vadd.f32 %v1193_v59, %v2278_v56 }
 0x3b9   : > { %v1234_v41 = vadd.f32 %v1204_v20, %v2275_v55 }
 0x3ba   : > { %v1232_v16 = vadd.f32 %v1196_v49, %v2281_v57 }
 0x3bb   : > { %v1244_v63 = vpack.c.bf16 %v1234_v41, %v1233_v39 }
 0x3bc   : > { %v1243_v0 = vpack.c.bf16 %v1232_v16, %v1231_v42  ;;  %v1727_v21 = vpop.f32.mrb[36].mxu1 }
 0x3bd   : > { %v1217_v22 = vadd.f32 %v1727_v21, %v1543_v47  ;;  %v1208_v28 = vpop.f32.mrb[37].mxu1 }
 0x3be   : > { %v1209_v1 = vadd.f32 %v1543_v47, %v1208_v28  ;;  %v1728_v2 = vpop.f32.mrb[38].mxu1  ;;  %1741 = vmatprep.mubr.msk.bf16.mxu0 %vm436_vm0, %v1243_v0 }
 0x3bf   : > { %v1220_v6 = vadd.f32 %v1728_v2, %v1543_v47  ;;  %v1211_v10 = vpop.f32.mrb[39].mxu1  ;;  %1742 = vmatmul.mubr.msk.bf16.gmra.mrb[32].mxu0 %vm436_vm0, %v1244_v63  ;;  %v1237_v56 = vadd.f32 %v1217_v22, %v2303_v62 }
 0x3c0   : > { %v1212_v55 = vadd.f32 %v1543_v47, %v1211_v10  ;;  %v1235_v58 = vadd.f32 %v1209_v1, %v2297_v19 }
 0x3c1   : > { %v1238_v57 = vadd.f32 %v1220_v6, %v2294_v61 }
 0x3c2   : > { %v1236_v11 = vadd.f32 %v1212_v55, %v2300_v46 }
 0x3c3   : > { %v1246_v15 = vpack.c.bf16 %v1238_v57, %v1237_v56 }
 0x3c4   : > { %v1245_v17 = vpack.c.bf16 %v1236_v11, %v1235_v58 }
 0x3c6   : > { %1745 = vmatprep.mubr.msk.bf16.mxu0 %vm436_vm0, %v1245_v17 }
 0x3c7   : > { %1746 = vmatmul.mubr.msk.bf16.gmra.mrb[36].mxu0 %vm436_vm0, %v1246_v15 }
 0x481   : > { %v1735_v62 = vpop.f32.mrb[24].mxu0 }
 0x482   : > { %v1337_v24 = vadd.f32 %v1735_v62, %v1558_v18  ;;  %v1328_v61 = vpop.f32.mrb[25].mxu0 }
 0x483   : > { %v1329_v27 = vadd.f32 %v1558_v18, %v1328_v61  ;;  %v1736_v19 = vpop.f32.mrb[26].mxu0 }
 0x484   : > { %1393 = vst [vmem:[%s2367_s13 + $0x10] sm:$0xff] %v1337_v24  ;;  %v1340_v46 = vadd.f32 %v1736_v19, %v1558_v18  ;;  %v1331_v47 = vpop.f32.mrb[27].mxu0 }
 0x485   : > { %1391 = vst [vmem:[%s2367_s13] sm:$0xff] %v1329_v27  ;;  %v1332_v29 = vadd.f32 %v1558_v18, %v1331_v47 }
 0x486   : > { %1394 = vst [vmem:[%s2367_s13 + $0x18] sm:$0xff] %v1340_v46 }
 0x487   : > { %1392 = vst [vmem:[%s2367_s13 + $0x8] sm:$0xff] %v1332_v29 }
 0x489   : > { %v1739_v31 = vpop.f32.mrb[28].mxu0 }
 0x48a   : > { %v1353_v33 = vadd.f32 %v1739_v31, %v1558_v18  ;;  %v1344_v7 = vpop.f32.mrb[29].mxu0 }
 0x48b   : > { %v1345_v34 = vadd.f32 %v1558_v18, %v1344_v7  ;;  %v1740_v35 = vpop.f32.mrb[30].mxu0 }
 0x48c   : > { %1397 = vst [vmem:[%s2367_s13 + $0x30] sm:$0xff] %v1353_v33  ;;  %v1356_v3 = vadd.f32 %v1740_v35, %v1558_v18  ;;  %v1347_v36 = vpop.f32.mrb[31].mxu0 }
 0x48d   : > { %1395 = vst [vmem:[%s2367_s13 + $0x20] sm:$0xff] %v1345_v34  ;;  %v1348_v4 = vadd.f32 %v1558_v18, %v1347_v36 }
 0x48e   : > { %1398 = vst [vmem:[%s2367_s13 + $0x38] sm:$0xff] %v1356_v3 }
 0x48f   : > { %1396 = vst [vmem:[%s2367_s13 + $0x28] sm:$0xff] %v1348_v4 }
 0x492   : > { %v1743_v37 = vpop.f32.mrb[32].mxu0 }
 0x493   : > { %v1369_v5 = vadd.f32 %v1743_v37, %v1558_v18  ;;  %v1360_v38 = vpop.f32.mrb[33].mxu0 }
 0x494   : > { %v1361_v40 = vadd.f32 %v1558_v18, %v1360_v38  ;;  %v1744_v32 = vpop.f32.mrb[34].mxu0 }
 0x495   : > { %1401 = vst [vmem:[%s2367_s13 + $0x50] sm:$0xff] %v1369_v5  ;;  %v1372_v48 = vadd.f32 %v1744_v32, %v1558_v18  ;;  %v1363_v50 = vpop.f32.mrb[35].mxu0 }
 0x496   : > { %1399 = vst [vmem:[%s2367_s13 + $0x40] sm:$0xff] %v1361_v40  ;;  %v1364_v43 = vadd.f32 %v1558_v18, %v1363_v50 }
 0x497   : > { %1402 = vst [vmem:[%s2367_s13 + $0x58] sm:$0xff] %v1372_v48 }
 0x498   : > { %1400 = vst [vmem:[%s2367_s13 + $0x48] sm:$0xff] %v1364_v43 }
 0x49a   : > { %v1747_v13 = vpop.f32.mrb[36].mxu0 }
 0x49b   : > { %v1385_v51 = vadd.f32 %v1747_v13, %v1558_v18  ;;  %v1376_v52 = vpop.f32.mrb[37].mxu0 }
 0x49c   : > { %v1377_v8 = vadd.f32 %v1558_v18, %v1376_v52  ;;  %v1748_v30 = vpop.f32.mrb[38].mxu0 }
 0x49d   : > { %1405 = vst [vmem:[%s2367_s13 + $0x70] sm:$0xff] %v1385_v51  ;;  %v1388_v23 = vadd.f32 %v1748_v30, %v1558_v18  ;;  %v1379_v25 = vpop.f32.mrb[39].mxu0 }
 0x49e   : > { %1403 = vst [vmem:[%s2367_s13 + $0x60] sm:$0xff] %v1377_v8  ;;  %v1380_v26 = vadd.f32 %v1558_v18, %v1379_v25 }
 0x49f   : > { %1406 = vst [vmem:[%s2367_s13 + $0x78] sm:$0xff] %v1388_v23 }
 0x4a0   : > { %1404 = vst [vmem:[%s2367_s13 + $0x68] sm:$0xff] %v1380_v26 }
 0x4a1   : > { %1901 = shalt.err (!%p1898_p3)
}
 0x4a2   : > { %s1902_s25 = scalar_lea.hbm %s2387_s24, 2048  ;;  %s1906_s22 = scalar_lea.hbm %s2448_s11, 4096 }
 0x4a3   : > { %p1903_p4 = scmp.ne.s32.totalorder %s2387_s24, %s1902_s25  ;;  %p1907_p9 = scmp.lt.u32.totalorder %s2387_s24, %s2448_s11 }
 0x4a4   : > { %p1908_p10 = scmp.lt.u32.totalorder %s1906_s22, %s1902_s25  ;;  %p1910_p12 = scmp.lt.u32.totalorder %s1902_s25, %s2387_s24 }
 0x4a5   : > { %p1904_p7 = pnand %p1903_p4, %p2053_p5 }
 0x4a6   : > { %p1909_p11 = por %p1908_p10, %p1907_p9 }
 0x4a7   : > { %p1905_p8 = pneg %p1904_p7 }
 0x4a8   : > { %p1911_p13 = por %p1910_p12, %p1909_p11 }
 0x4aa   : > { %p1912_p0 = pnand %p1911_p13, %p1905_p8 }
 0x4ac   : > { %1915 = shalt.err (!%p1912_p0)
}
 0x4ad   : > { %s1953_s30 = smov 128   ;;  %s1954_s14 = smov 8  }
 0x4ae   : > { %1765 = dma.vmem_to_hbm [thread:$0]  (%p2053_p5), %s2389_s15, 2048, %s2387_s24, %s2396_s21, %s1953_s30, %s1953_s30, %s1954_s14  }
 0x4af PF: > { %p1771_p1 = scmp.ge.s32.totalorder %s1950_s20, 2  ;;  %s1436_s13 = sand.u32 1, %s1938_s17  }
 0x4b0   : > { %s1437_s25 = scalar_lea.sflag [#allocation3], %s1436_s13 }
 0x4b1   : > { %p1768_p2 = pnand %p1771_p1, %p2057_p6 }
 0x4b3   : > { %1933 = dma.done.wait (!%p1768_p2), %s1437_s25, 2048  }
 0x4b4   : > { %1935 = vsyncadd (!%p1768_p2), %s1437_s25, 4294965248  ;;  %p21_p3 = scmp.ge.s32.totalorder %s2040_s23, 4   ;;  %s2451_s17 = smov %s1942_s18 }
 0x4b5   : > { %s2452_s18 = smov %s1946_s19  ;;  %s2453_s19 = smov %s2051_s26 }
 0x4b6   : > { %s2454_s20 = smov %s2040_s23  ;;  %23 = sbr.rel (!%p21_p3) target bundleno = 3 (0x3), region = 99 }
 0x4bd   :  { %1442 = vsyncpa [#allocation3], 1 }
 0x4be   :  { %1444 = vsyncpa [#allocation3 + $0x1], 1 }

</bundles_post_ra>
